<compile_context>
chip_gen: v7x
topology: tpu7x:2x2x1
jax: 0.10.0
libtpu: 0.0.40
codegen_flags: <defaults>
</compile_context>

<pallas_src>
import math
import jax
import jax.numpy as jnp
from jax.experimental import pallas as pl
from jax.experimental.pallas import tpu as pltpu

LN_EPS = 1e-5                      # torch.nn.LayerNorm default eps
_INV_SQRT2 = 1.0 / math.sqrt(2.0)  # exact (erf) GELU, torch.nn.GELU default


def _round_up(x, m):
    return ((x + m - 1) // m) * m


def _vmem_capacity_bytes():
    """Physical VMEM per TensorCore (v5e/v6e: 128 MiB, v7x: 64 MiB)."""
    try:
        info = pltpu.get_tpu_info()
        for name in ("vmem_capacity_bytes", "vmem_size_bytes"):
            cap = getattr(info, name, None)
            if cap:
                return int(cap)
    except Exception:
        pass
    return 64 << 20   # conservative fallback (v7x per-TC capacity)


def _default_streaming_row_tile():
    """Row tile for the weight-streaming (H-chunked) path.

    Each k step moves ~4*D*tH bf16 weight bytes and does ~4*tm*D*tH flops,
    i.e. arithmetic intensity ~= tm flop/byte.  Pick tm above the per-chip
    MXU-TFLOPs / HBM-BW ratio (v6e ~650; v7x ~310 per TC but both TCs stream
    their own weight copy under megacore sharding; v5e ~240).
    """
    try:
        kind = jax.devices()[0].device_kind.lower()
    except Exception:
        kind = ""
    if "v5" in kind:
        return 256
    if "v6" in kind or "v7" in kind:
        return 768
    return 512


# ---------------------------------------------------------------------------
# Kernels
# ---------------------------------------------------------------------------
def _ffn_kernel_resident(x_ref, gamma_ref, beta_ref, w1_ref, b1_ref,
                         w2_ref, b2_ref, o_ref):
    # LayerNorm in f32 (exact-GELU / torch parity; v5e has no bf16 VPU/EUP).
    x = x_ref[...].astype(jnp.float32)                           # (tm, D)
    mu = jnp.mean(x, axis=-1, keepdims=True)
    xc = x - mu
    var = jnp.mean(xc * xc, axis=-1, keepdims=True)
    xn = xc * jax.lax.rsqrt(var + LN_EPS) * gamma_ref[...] + beta_ref[...]

    # Linear(D -> H): bf16 MXU operands, f32 accumulation.
    h = jnp.dot(xn.astype(jnp.bfloat16), w1_ref[...],
                preferred_element_type=jnp.float32)              # (tm, H)
    h = h + b1_ref[...]
    h = 0.5 * h * (1.0 + jax.lax.erf(h * _INV_SQRT2))            # exact GELU

    # Linear(H -> D): write the output directly (no accumulator round trip).
    y = jnp.dot(h.astype(jnp.bfloat16), w2_ref[...],
                preferred_element_type=jnp.float32)              # (tm, D)
    o_ref[...] = (y + b2_ref[...]).astype(o_ref.dtype)


def _ffn_kernel_chunked(x_ref, gamma_ref, beta_ref, w1_ref, b1_ref,
                        w2_ref, b2_ref, o_ref, xn_ref, acc_ref):
    k = pl.program_id(1)             # hidden-dim chunk (reduction, innermost)

    # Per-row-tile LayerNorm, done once (k == 0) and cached as bf16.
    @pl.when(k == 0)
    def _():
        x = x_ref[...].astype(jnp.float32)
        mu = jnp.mean(x, axis=-1, keepdims=True)
        xc = x - mu
        var = jnp.mean(xc * xc, axis=-1, keepdims=True)
        xn = xc * jax.lax.rsqrt(var + LN_EPS) * gamma_ref[...] + beta_ref[...]
        xn_ref[...] = xn.astype(jnp.bfloat16)

    # Linear(D -> tH) + exact GELU + partial Linear(tH -> D).
    h = jnp.dot(xn_ref[...], w1_ref[...],
                preferred_element_type=jnp.float32)              # (tm, tH)
    h = h + b1_ref[...]
    h = 0.5 * h * (1.0 + jax.lax.erf(h * _INV_SQRT2))
    part = jnp.dot(h.astype(jnp.bfloat16), w2_ref[...],
                   preferred_element_type=jnp.float32)           # (tm, D)

    @pl.when(k == 0)
    def _():
        acc_ref[...] = part           # direct write: no zero-init store pass

    @pl.when(k > 0)
    def _():
        acc_ref[...] += part

    @pl.when(k == pl.num_programs(1) - 1)
    def _():
        o_ref[...] = (acc_ref[...] + b2_ref[...]).astype(o_ref.dtype)


# ---------------------------------------------------------------------------
# Host wrapper
# ---------------------------------------------------------------------------
def feed_forward(x, gamma, beta, w1, b1, w2, b2, *, row_tile=None, h_tile=None):
    """Fused LayerNorm + MLP.  x: (B, S, D); weights use y = x @ W + b.

    row_tile: rows (tokens) per grid step (MXU M operand).  None = auto.
    h_tile:   hidden-dim chunk (multiple of 128) for weight streaming.
              None = auto (weights kept fully VMEM-resident when they fit).
    """
    B, S, D = x.shape
    H = w1.shape[1]
    R = B * S

    x2 = x.reshape(R, D)
    # Ragged row tiles are masked by Pallas; only pad to the 8-row sublane
    # granule if needed (<= 7 rows, negligible).
    R_eff = _round_up(R, 8)
    padded = R_eff != R
    if padded:
        x2 = jnp.pad(x2, ((0, R_eff - R), (0, 0)))

    xb = x2.dtype.itemsize
    D_pad = _round_up(D, 128)
    H_pad = _round_up(H, 128)

    cap = _vmem_capacity_bytes()
    usable = max(cap - (8 << 20), 16 << 20)      # headroom for compiler scratch
    budget = int(0.85 * usable)

    def resident_bytes(tm):
        return (
            4 * tm * D * xb                        # x + out tiles (2 buffers each)
            + 2 * (D * H_pad + H_pad * D) * 2      # W1/W2 bf16 slabs (2 buffers)
            + 2 * 8 * H_pad * 4                    # b1 (row-padded)
            + 3 * 2 * 8 * D_pad * 4                # gamma / beta / b2
            + tm * D_pad * 2                       # xn bf16 live value
            + 2 * tm * H_pad * 4 + tm * H_pad * 2  # h f32 temporaries + bf16 cast
            + tm * D_pad * 4                       # f32 result before downcast
        )

    def chunked_bytes(tm, tH):
        return (
            4 * tm * D * xb
            + 2 * (D * tH + tH * D) * 2            # W1/W2 chunks (2 buffers)
            + 2 * 8 * tH * 4                       # b1 chunk
            + 3 * 2 * 8 * D_pad * 4                # gamma / beta / b2
            + tm * D_pad * 2 + tm * D_pad * 4      # xn + acc scratch
            + 2 * tm * tH * 4 + tm * tH * 2        # h f32 temporaries + bf16 cast
            + tm * D_pad * 4
        )

    def clip_tm(t):
        return max(8, min(_round_up(t, 8), R_eff))

    use_resident = False
    tm = tH = est = None
    if h_tile is None:
        tm_try = clip_tm(row_tile if row_tile is not None else 256)
        if resident_bytes(tm_try) <= budget:
            use_resident, tm, est = True, tm_try, resident_bytes(tm_try)

    if not use_resident:
        tm = clip_tm(row_tile if row_tile is not None
                     else _default_streaming_row_tile())
        if h_tile is not None:
            assert H % h_tile == 0 and h_tile % 128 == 0, (
                "h_tile must divide hidden_dim and be a multiple of 128")
            tH = h_tile
        else:
            cands = [t for t in range(128, H + 1, 128) if H % t == 0]
            tH = next((t for t in sorted(cands, reverse=True)
                       if chunked_bytes(tm, t) <= budget),
                      cands[0] if cands else None)
        if tH is None:
            # H has no 128-multiple divisor: cannot stream -> stay resident.
            use_resident = True
            tm = clip_tm(row_tile if row_tile is not None else 256)
            est = resident_bytes(tm)
        else:
            est = chunked_bytes(tm, tH)

    # Clamp to the chip's real capacity (v7x: 64 MiB per TC) minus headroom.
    vmem_limit = int(min(max(int(1.25 * est) + (4 << 20), 24 << 20), usable))

    # Weights pre-cast to bf16 once on the host (MXU operands, f32 accumulate).
    gamma2 = gamma.reshape(1, D).astype(jnp.float32)
    beta2 = beta.reshape(1, D).astype(jnp.float32)
    w1_bf = w1.astype(jnp.bfloat16)
    w2_bf = w2.astype(jnp.bfloat16)
    b1_2 = b1.reshape(1, H).astype(jnp.float32)
    b2_2 = b2.reshape(1, D).astype(jnp.float32)

    n_row = pl.cdiv(R_eff, tm)

    if use_resident:
        out = pl.pallas_call(
            _ffn_kernel_resident,
            out_shape=jax.ShapeDtypeStruct((R_eff, D), x.dtype),
            grid_spec=pltpu.PrefetchScalarGridSpec(
                num_scalar_prefetch=0,
                grid=(n_row,),
                in_specs=[
                    pl.BlockSpec((tm, D), lambda i: (i, 0)),   # x rows
                    pl.BlockSpec((1, D), lambda i: (0, 0)),    # LN gamma
                    pl.BlockSpec((1, D), lambda i: (0, 0)),    # LN beta
                    pl.BlockSpec((D, H), lambda i: (0, 0)),    # W1 (bf16, resident)
                    pl.BlockSpec((1, H), lambda i: (0, 0)),    # b1
                    pl.BlockSpec((H, D), lambda i: (0, 0)),    # W2 (bf16, resident)
                    pl.BlockSpec((1, D), lambda i: (0, 0)),    # b2
                ],
                out_specs=pl.BlockSpec((tm, D), lambda i: (i, 0)),
            ),
            compiler_params=pltpu.CompilerParams(
                dimension_semantics=("parallel",),
                vmem_limit_bytes=vmem_limit,
            ),
        )(x2, gamma2, beta2, w1_bf, b1_2, w2_bf, b2_2)
    else:
        out = pl.pallas_call(
            _ffn_kernel_chunked,
            out_shape=jax.ShapeDtypeStruct((R_eff, D), x.dtype),
            grid_spec=pltpu.PrefetchScalarGridSpec(
                num_scalar_prefetch=0,
                grid=(n_row, H // tH),
                in_specs=[
                    pl.BlockSpec((tm, D), lambda i, k: (i, 0)),    # x rows
                    pl.BlockSpec((1, D), lambda i, k: (0, 0)),     # LN gamma
                    pl.BlockSpec((1, D), lambda i, k: (0, 0)),     # LN beta
                    pl.BlockSpec((D, tH), lambda i, k: (0, k)),    # W1 chunk
                    pl.BlockSpec((1, tH), lambda i, k: (0, k)),    # b1 chunk
                    pl.BlockSpec((tH, D), lambda i, k: (k, 0)),    # W2 chunk
                    pl.BlockSpec((1, D), lambda i, k: (0, 0)),     # b2
                ],
                out_specs=pl.BlockSpec((tm, D), lambda i, k: (i, 0)),
                scratch_shapes=[
                    pltpu.VMEM((tm, D), jnp.bfloat16),   # normalized x (bf16)
                    pltpu.VMEM((tm, D), jnp.float32),    # output accumulator
                ],
            ),
            compiler_params=pltpu.CompilerParams(
                dimension_semantics=("parallel", "arbitrary"),
                vmem_limit_bytes=vmem_limit,
            ),
        )(x2, gamma2, beta2, w1_bf, b1_2, w2_bf, b2_2)

    if padded:
        out = out[:R]
    return out.reshape(B, S, D)


if __name__ == "__main__":
    # Small shapes consistent with the module (tokens of width dim, MLP hidden).
    B, S, D, H = 2, 8, 32, 64

    key = jax.random.PRNGKey(0)
    kx, kw1, kb1, kw2, kb2 = jax.random.split(key, 5)

    x = jax.random.normal(kx, (B, S, D), dtype=jnp.float32)

    # Deterministic parameters (shapes from nn.LayerNorm / nn.Linear); Linear
    # weights stored as (in, out) so the kernel computes x @ W + b.
    gamma = jnp.ones((D,), jnp.float32)
    beta = jnp.zeros((D,), jnp.float32)
    lim1 = 1.0 / math.sqrt(D)
    w1 = jax.random.uniform(kw1, (D, H), jnp.float32, -lim1, lim1)
    b1 = jax.random.uniform(kb1, (H,), jnp.float32, -lim1, lim1)
    lim2 = 1.0 / math.sqrt(H)
    w2 = jax.random.uniform(kw2, (H, D), jnp.float32, -lim2, lim2)
    b2 = jax.random.uniform(kb2, (D,), jnp.float32, -lim2, lim2)

    y = feed_forward(x, gamma, beta, w1, b1, w2, b2)
    jax.block_until_ready(y)

    # Pure-JAX f32 reference (same math as the PyTorch module, dropout p=0).
    # Kernel uses bf16 MXU operands with f32 accumulation -> bf16-level tol.
    xf = x.astype(jnp.float32)
    mu = jnp.mean(xf, -1, keepdims=True)
    var = jnp.mean((xf - mu) ** 2, -1, keepdims=True)
    xn = (xf - mu) * jax.lax.rsqrt(var + LN_EPS) * gamma + beta
    h = jax.nn.gelu(xn @ w1 + b1, approximate=False)
    y_ref = h @ w2 + b2
    assert jnp.allclose(y, y_ref, atol=5e-2, rtol=5e-2), "mismatch vs reference"

    print("KERNEL_OK")
</pallas_src>

<mosaic_0001>
module attributes {stable_mosaic.version = 11 : i64} {
  func.func @_ffn_kernel_resident(%arg0: i32, %arg1: memref<16x32xf32, #tpu.memory_space<vmem>>, %arg2: memref<1x32xf32, #tpu.memory_space<vmem>>, %arg3: memref<1x32xf32, #tpu.memory_space<vmem>>, %arg4: memref<32x64xbf16, #tpu.memory_space<vmem>>, %arg5: memref<1x64xf32, #tpu.memory_space<vmem>>, %arg6: memref<64x32xbf16, #tpu.memory_space<vmem>>, %arg7: memref<1x32xf32, #tpu.memory_space<vmem>>, %arg8: memref<16x32xf32, #tpu.memory_space<vmem>>) attributes {dimension_semantics = [#tpu.dimension_semantics<parallel>], iteration_bounds = array<i64: 1>, scalar_prefetch = 0 : i64, scratch_operands = 0 : i64, tpu.core_type = #tpu.core_type<tc>, window_params = [{transform_indices = @transform_0, window_bounds = array<i64: 16, 32>}, {pipeline_mode = #tpu.pipeline_mode<synchronous>, transform_indices = @transform_1, window_bounds = array<i64: 1, 32>}, {pipeline_mode = #tpu.pipeline_mode<synchronous>, transform_indices = @transform_2, window_bounds = array<i64: 1, 32>}, {pipeline_mode = #tpu.pipeline_mode<synchronous>, transform_indices = @transform_3, window_bounds = array<i64: 32, 64>}, {pipeline_mode = #tpu.pipeline_mode<synchronous>, transform_indices = @transform_4, window_bounds = array<i64: 1, 64>}, {pipeline_mode = #tpu.pipeline_mode<synchronous>, transform_indices = @transform_5, window_bounds = array<i64: 64, 32>}, {pipeline_mode = #tpu.pipeline_mode<synchronous>, transform_indices = @transform_6, window_bounds = array<i64: 1, 32>}, {transform_indices = @transform_7, window_bounds = array<i64: 16, 32>}]} {
    %c0 = arith.constant 0 : index
    %c0_0 = arith.constant 0 : index
    %0 = vector.load %arg1[%c0, %c0_0] : memref<16x32xf32, #tpu.memory_space<vmem>>, vector<16x32xf32>
    %cst = arith.constant dense<0.000000e+00> : vector<16xf32>
    %1 = vector.multi_reduction <add>, %0, %cst [1] : vector<16x32xf32> to vector<16xf32>
    %2 = vector.shape_cast %1 : vector<16xf32> to vector<16x1xf32>
    %cst_1 = arith.constant 3.200000e+01 : f32
    %3 = vector.broadcast %cst_1 : f32 to vector<16x1xf32>
    %4 = arith.divf %2, %3 : vector<16x1xf32>
    %5 = vector.broadcast %4 : vector<16x1xf32> to vector<16x32xf32>
    %6 = arith.subf %0, %5 : vector<16x32xf32>
    %7 = arith.mulf %6, %6 : vector<16x32xf32>
    %cst_2 = arith.constant dense<0.000000e+00> : vector<16xf32>
    %8 = vector.multi_reduction <add>, %7, %cst_2 [1] : vector<16x32xf32> to vector<16xf32>
    %9 = vector.shape_cast %8 : vector<16xf32> to vector<16x1xf32>
    %cst_3 = arith.constant 3.200000e+01 : f32
    %10 = vector.broadcast %cst_3 : f32 to vector<16x1xf32>
    %11 = arith.divf %9, %10 : vector<16x1xf32>
    %cst_4 = arith.constant 9.99999974E-6 : f32
    %12 = vector.broadcast %cst_4 : f32 to vector<16x1xf32>
    %13 = arith.addf %11, %12 : vector<16x1xf32>
    %14 = math.rsqrt %13 : vector<16x1xf32>
    %15 = vector.broadcast %14 : vector<16x1xf32> to vector<16x32xf32>
    %16 = arith.mulf %6, %15 : vector<16x32xf32>
    %c0_5 = arith.constant 0 : index
    %c0_6 = arith.constant 0 : index
    %17 = vector.load %arg2[%c0_5, %c0_6] : memref<1x32xf32, #tpu.memory_space<vmem>>, vector<1x32xf32>
    %18 = vector.broadcast %17 : vector<1x32xf32> to vector<16x32xf32>
    %19 = arith.mulf %16, %18 : vector<16x32xf32>
    %c0_7 = arith.constant 0 : index
    %c0_8 = arith.constant 0 : index
    %20 = vector.load %arg3[%c0_7, %c0_8] : memref<1x32xf32, #tpu.memory_space<vmem>>, vector<1x32xf32>
    %21 = vector.broadcast %20 : vector<1x32xf32> to vector<16x32xf32>
    %22 = arith.addf %19, %21 : vector<16x32xf32>
    %23 = arith.truncf %22 : vector<16x32xf32> to vector<16x32xbf16>
    %c0_9 = arith.constant 0 : index
    %c0_10 = arith.constant 0 : index
    %24 = vector.load %arg4[%c0_9, %c0_10] : memref<32x64xbf16, #tpu.memory_space<vmem>>, vector<32x64xbf16>
    %cst_11 = arith.constant dense<0.000000e+00> : vector<16x64xf32>
    %25 = tpu.matmul %23, %24, %cst_11 {dimension_numbers = #tpu.dot_dimension_numbers<[1], [0], [0], [1], [0, 0, 1, 1], [], []>} : vector<16x32xbf16>, vector<32x64xbf16>, vector<16x64xf32> -> vector<16x64xf32>
    %c0_12 = arith.constant 0 : index
    %c0_13 = arith.constant 0 : index
    %26 = vector.load %arg5[%c0_12, %c0_13] : memref<1x64xf32, #tpu.memory_space<vmem>>, vector<1x64xf32>
    %27 = vector.broadcast %26 : vector<1x64xf32> to vector<16x64xf32>
    %28 = arith.addf %25, %27 : vector<16x64xf32>
    %cst_14 = arith.constant 5.000000e-01 : f32
    %29 = vector.broadcast %cst_14 : f32 to vector<16x64xf32>
    %30 = arith.mulf %29, %28 : vector<16x64xf32>
    %cst_15 = arith.constant 0.707106769 : f32
    %31 = vector.broadcast %cst_15 : f32 to vector<16x64xf32>
    %32 = arith.mulf %28, %31 : vector<16x64xf32>
    %33 = math.erf %32 : vector<16x64xf32>
    %cst_16 = arith.constant 1.000000e+00 : f32
    %34 = vector.broadcast %cst_16 : f32 to vector<16x64xf32>
    %35 = arith.addf %34, %33 : vector<16x64xf32>
    %36 = arith.mulf %30, %35 : vector<16x64xf32>
    %37 = arith.truncf %36 : vector<16x64xf32> to vector<16x64xbf16>
    %c0_17 = arith.constant 0 : index
    %c0_18 = arith.constant 0 : index
    %38 = vector.load %arg6[%c0_17, %c0_18] : memref<64x32xbf16, #tpu.memory_space<vmem>>, vector<64x32xbf16>
    %cst_19 = arith.constant dense<0.000000e+00> : vector<16x32xf32>
    %39 = tpu.matmul %37, %38, %cst_19 {dimension_numbers = #tpu.dot_dimension_numbers<[1], [0], [0], [1], [0, 0, 1, 1], [], []>} : vector<16x64xbf16>, vector<64x32xbf16>, vector<16x32xf32> -> vector<16x32xf32>
    %c0_20 = arith.constant 0 : index
    %c0_21 = arith.constant 0 : index
    %40 = vector.load %arg7[%c0_20, %c0_21] : memref<1x32xf32, #tpu.memory_space<vmem>>, vector<1x32xf32>
    %41 = vector.broadcast %40 : vector<1x32xf32> to vector<16x32xf32>
    %42 = arith.addf %39, %41 : vector<16x32xf32>
    %c0_22 = arith.constant 0 : index
    %c0_23 = arith.constant 0 : index
    %43 = vector.load %arg8[%c0_22, %c0_23] : memref<16x32xf32, #tpu.memory_space<vmem>>, vector<16x32xf32>
    tpu.vector_store %arg8[%c0_22, %c0_23], %42 {strides = array<i32>} : memref<16x32xf32, #tpu.memory_space<vmem>>, vector<16x32xf32>,
    return
  }
  func.func @transform_0(%arg0: i32) -> (i32, i32) {
    %c0_i32 = arith.constant 0 : i32
    %c0_i32_0 = arith.constant 0 : i32
    return %arg0, %c0_i32 : i32, i32
  }
  func.func @transform_1(%arg0: i32) -> (i32, i32) {
    %c0_i32 = arith.constant 0 : i32
    %c0_i32_0 = arith.constant 0 : i32
    %c0_i32_1 = arith.constant 0 : i32
    return %c0_i32, %c0_i32_0 : i32, i32
  }
  func.func @transform_2(%arg0: i32) -> (i32, i32) {
    %c0_i32 = arith.constant 0 : i32
    %c0_i32_0 = arith.constant 0 : i32
    %c0_i32_1 = arith.constant 0 : i32
    return %c0_i32, %c0_i32_0 : i32, i32
  }
  func.func @transform_3(%arg0: i32) -> (i32, i32) {
    %c0_i32 = arith.constant 0 : i32
    %c0_i32_0 = arith.constant 0 : i32
    %c0_i32_1 = arith.constant 0 : i32
    return %c0_i32, %c0_i32_0 : i32, i32
  }
  func.func @transform_4(%arg0: i32) -> (i32, i32) {
    %c0_i32 = arith.constant 0 : i32
    %c0_i32_0 = arith.constant 0 : i32
    %c0_i32_1 = arith.constant 0 : i32
    return %c0_i32, %c0_i32_0 : i32, i32
  }
  func.func @transform_5(%arg0: i32) -> (i32, i32) {
    %c0_i32 = arith.constant 0 : i32
    %c0_i32_0 = arith.constant 0 : i32
    %c0_i32_1 = arith.constant 0 : i32
    return %c0_i32, %c0_i32_0 : i32, i32
  }
  func.func @transform_6(%arg0: i32) -> (i32, i32) {
    %c0_i32 = arith.constant 0 : i32
    %c0_i32_0 = arith.constant 0 : i32
    %c0_i32_1 = arith.constant 0 : i32
    return %c0_i32, %c0_i32_0 : i32, i32
  }
  func.func @transform_7(%arg0: i32) -> (i32, i32) {
    %c0_i32 = arith.constant 0 : i32
    %c0_i32_0 = arith.constant 0 : i32
    return %arg0, %c0_i32 : i32, i32
  }
}

</mosaic_0001>

<bundles_post_ra>
// kernel: tpu_custom_call.1
= control target key start
LH: loop header
LB: loop body
LE: loop exit
PB: predicated region body
PF: predicated region fallthrough
CT: control target
= control target key end

     0   :  { %vm30_vm0 = vcmask 261120   ;;  %s440_s0 = inlined_call_operand.vmem [shape: f32[16,32], index: 0, kind: input, shape index: {}]   ;;  %s441_s1 = inlined_call_operand.vmem [shape: f32[1,32], index: 1, kind: input, shape index: {}]   ;;  %s442_s2 = inlined_call_operand.vmem [shape: f32[1,32], index: 2, kind: input, shape index: {}]   ;;  %s443_s3 = inlined_call_operand.vmem [shape: bf16[32,64], index: 3, kind: input, shape index: {}]   ;;  %s444_s4 = inlined_call_operand.vmem [shape: f32[1,64], index: 4, kind: input, shape index: {}]   ;;  %s445_s5 = inlined_call_operand.vmem [shape: bf16[64,32], index: 5, kind: input, shape index: {}]   ;;  %s446_s6 = inlined_call_operand.vmem [shape: f32[1,32], index: 6, kind: input, shape index: {}]   ;;  %s447_s7 = inlined_call_operand.hbm [shape: f32[16,32], index: 7, kind: output, shape index: {}]  }
   0x1   :  { %v28_v0 = vld [vmem:[%s440_s0] sm:$0xff]  ;;  %v29_v1 = vld [vmem:[%s440_s0 + $0x8] sm:$0xff] }
   0x2   :  { %v31_v2 = vsel %vm30_vm0, %v28_v0, 0.0  ;;  %v34_v3 = vsel %vm30_vm0, %v29_v1, 0.0 }
   0x3   :  { %32 = vadd.xlane.f32.xlu0 %v31_v2 }
   0x4   :  { %12 = vsyncpa [#allocation3], 0  ;;  %v302_v14 = vld [vmem:[%s443_s3] sm:$0xff]   ;;  %v340_v15 = vmov 0.0   ;;  %v303_v16 = vld [vmem:[%s443_s3 + $0x8] sm:$0xff]   ;;  %vm341_vm1 = vmmov 0  }
   0x5   :  { %277 = vmatprep.subr.bf16.mxu0 %v340_v15  ;;  %285 = vmatprep.subr.bf16.mxu1 %v340_v15  ;;  %v257_v25 = vld [vmem:[%s441_s1] ss:$0 sm:$0xff]  ;;  %v305_v35 = vld [vmem:[%s445_s5 + $0x8] sm:$0xff]   ;;  %v306_v36 = vld [vmem:[%s445_s5 + $0x10] sm:$0xff]   ;;  %vm194_vm2 = vcmask 523264   ;;  %s342_s19 = smov [#allocation2]  }
   0x6   :  { %278 = vmatpush3.bf16.msra.mxu0 %v302_v14  ;;  %281 = vmatprep.mubr.msk.bf16.mxu0 %vm341_vm1, %v340_v15  ;;  %v258_v29 = vld [vmem:[%s442_s2] ss:$0 sm:$0xff]  ;;  %v307_v37 = vld [vmem:[%s445_s5 + $0x18] sm:$0xff]   ;;  %s246_s20 = sshll.u32 %s342_s19, 4  ;;  %s247_s20 = int_to_ptr.vmem [resolvable:$true] %s246_s20 }
   0x7   :  { %35 = vadd.xlane.f32.xlu0 %v34_v3  ;;  %279 = vmatprep.subr.bf16.mxu0 %v340_v15  ;;  %v304_v34 = vld [vmem:[%s445_s5] sm:$0xff]   ;;  %s316_s21 = scalar_lea.vmem %s247_s20, 256  ;;  %p321_p1 = scmp.lt.s32.totalorder %s247_s20, %s247_s20 }
   0x8   :  { %293 = vmatprep.mubr.msk.bf16.mxu1 %vm341_vm1, %v340_v15  ;;  %286 = vmatpush3.bf16.msra.mxu1 %v304_v34  ;;  %v259_v38 = vld [vmem:[%s444_s4] ss:$0 sm:$0xff]  ;;  %p317_p0 = scmp.ne.s32.totalorder %s247_s20, %s316_s21  ;;  %p322_p2 = scmp.lt.s32.totalorder %s316_s21, %s316_s21 }
   0x9   :  { %287 = vmatprep.subr.bf16.mxu1 %v340_v15  ;;  %v263_v56 = vld [vmem:[%s446_s6] ss:$0 sm:$0xff] }
   0xa   :  { %280 = vmatpush3.bf16.msra.mxu0 %v303_v16  ;;  %p323_p3 = por %p322_p2, %p321_p1 }
   0xc   :  { %288 = vmatpush3.bf16.msra.mxu1 %v305_v35  ;;  %p324_p4 = pnand %p323_p3, %p317_p0 }
   0xd   :  { %289 = vmatprep.subr.bf16.mxu1 %v340_v15 }
  0x10   :  { %290 = vmatpush3.bf16.msra.mxu1 %v306_v36 }
  0x11   :  { %291 = vmatprep.subr.bf16.mxu1 %v340_v15 }
  0x14   :  { %292 = vmatpush3.bf16.msra.mxu1 %v307_v37 }
  0x90   :  { %v33_v4 = vpop.xlane.xlu0 %32 }
  0x91   :  { %v38_v5 = vmul.f32 0.03125, %v33_v4 }
  0x93   :  { %v40_v6 = vsub.f32 %v28_v0, %v38_v5 }
  0x94   :  { %v36_v7 = vpop.xlane.xlu0 %35 }
  0x95   :  { %v39_v8 = vmul.f32 0.03125, %v36_v7  ;;  %v42_v9 = vmul.f32 %v40_v6, %v40_v6 }
  0x97   :  { %v41_v10 = vsub.f32 %v29_v1, %v39_v8  ;;  %v44_v11 = vsel %vm30_vm0, %v42_v9, 0.0 }
  0x98   :  { %45 = vadd.xlane.f32.xlu1 %v44_v11 }
  0x99   :  { %v43_v12 = vmul.f32 %v41_v10, %v41_v10 }
  0x9b   :  { %v47_v13 = vsel %vm30_vm0, %v43_v12, 0.0 }
  0x9c   :  { %48 = vadd.xlane.f32.xlu1 %v47_v13 }
 0x125   :  { %v46_v17 = vpop.xlane.xlu1 %45 }
 0x126   :  { %v50_v18 = vmul.f32 0.03125, %v46_v17 }
 0x128   :  { %v52_v19 = vadd.f32 1e-05, %v50_v18 }
 0x129   :  { %v49_v20 = vpop.xlane.xlu1 %48 }
 0x12a   :  { %308 = vrsqrt.f32 %v52_v19  ;;  %v51_v21 = vmul.f32 0.03125, %v49_v20 }
 0x12c   :  { %v53_v22 = vadd.f32 1e-05, %v51_v21 }
 0x12e   :  { %310 = vrsqrt.f32 %v53_v22 }
 0x134   :  { %v309_v23 = vpop.eup %308 }
 0x135   :  { %v56_v24 = vmul.f32 %v309_v23, %v40_v6 }
 0x137   :  { %v65_v28 = vmul.f32 %v257_v25, %v56_v24 }
 0x138   :  { %v311_v26 = vpop.eup %310 }
 0x139   :  { %v57_v27 = vmul.f32 %v311_v26, %v41_v10  ;;  %v74_v31 = vadd.f32 %v258_v29, %v65_v28 }
 0x13b   :  { %v66_v30 = vmul.f32 %v257_v25, %v57_v27 }
 0x13d   :  { %v75_v32 = vadd.f32 %v258_v29, %v66_v30 }
 0x13f   :  { %v76_v33 = vpack.c.bf16 %v75_v32, %v74_v31 }
 0x141   :  { %282 = vmatmul.mubr.msk.bf16.vlgmr.msra.gmra.mrb[0].mxu0 %vm30_vm0, %v76_v33 }
 0x214   :  { %v137_v39 = vpop.f32.mrb[0].mxu0 }
 0x215   :  { %v138_v40 = vadd.f32 %v259_v38, %v137_v39  ;;  %v283_v41 = vpop.f32.mrb[1].mxu0 }
 0x216   :  { %v140_v42 = vpop.f32.mrb[2].mxu0 }
 0x217   :  { %v146_v43 = vmul.f32 0.70710677, %v138_v40  ;;  %v141_v44 = vadd.f32 %v259_v38, %v140_v42  ;;  %v284_v45 = vpop.f32.mrb[3].mxu0  ;;  %v144_v50 = vmul.f32 0.5, %v138_v40 }
 0x219   :  { %312 = verf.f32 %v146_v43  ;;  %v147_v46 = vmul.f32 0.70710677, %v141_v44  ;;  %v145_v51 = vmul.f32 0.5, %v141_v44 }
 0x21b   :  { %314 = verf.f32 %v147_v46 }
 0x223   :  { %v313_v47 = vpop.eup %312 }
 0x224   :  { %v150_v48 = vadd.f32 1.0, %v313_v47 }
 0x225   :  { %v315_v49 = vpop.eup %314 }
 0x226   :  { %v151_v52 = vadd.f32 1.0, %v315_v49  ;;  %v152_v53 = vmul.f32 %v150_v48, %v144_v50 }
 0x228   :  { %v153_v54 = vmul.f32 %v151_v52, %v145_v51 }
 0x22a   :  { %v154_v55 = vpack.c.bf16 %v153_v54, %v152_v53 }
 0x22c   :  { %294 = vmatmul.mubr.msk.bf16.vlgmr.msra.gmra.mrb[0].mxu1 %vm194_vm2, %v154_v55 }
 0x2ff   :  { %v232_v57 = vpop.f32.mrb[0].mxu1 }
 0x300   :  { %v233_v58 = vadd.f32 %v263_v56, %v232_v57  ;;  %v295_v59 = vpop.f32.mrb[1].mxu1 }
 0x301   :  { %v235_v60 = vpop.f32.mrb[2].mxu1 }
 0x302   :  { %239 = vst.msk [vmem:[#allocation2] sm:$0xff] %vm30_vm0, %v233_v58  ;;  %v236_v61 = vadd.f32 %v263_v56, %v235_v60  ;;  %v296_v62 = vpop.f32.mrb[3].mxu1 }
 0x304   :  { %240 = vst.msk [vmem:[#allocation2 + $0x8] sm:$0xff] %vm30_vm0, %v236_v61 }
 0x305   :  { %327 = shalt.err (!%p324_p4)
}
 0x306   :  { %s328_s23 = scalar_lea.hbm %s447_s7, 256 }
 0x307   :  { %p329_p5 = scmp.ne.s32.totalorder %s447_s7, %s328_s23  ;;  %p332_p6 = scmp.lt.u32.totalorder %s328_s23, %s447_s7 }
 0x309   :  { %p334_p7 = pnand %p332_p6, %p329_p5 }
 0x30b   :  { %337 = shalt.err (!%p334_p7)
}
 0x30c   :  { %s343_s0 = smov 128   ;;  %s344_s28 = smov 8  }
 0x30d   :  { %252 = dma.vmem_to_hbm [thread:$0]  %s247_s20, 256, %s447_s7, [#allocation3], %s343_s0, %s343_s0, %s344_s28  }
 0x30e   :  { %338 = dma.done.wait [#allocation3], 256  }
 0x30f   :  { %339 = vsyncadd [#allocation3], 4294967040 }
 0x310   :  { %256 = vsyncpa [#allocation3], 1 }

</bundles_post_ra>
